<compile_context>
chip_gen: v7x
topology: tpu7x:2x2x1
jax: 0.10.0
libtpu: 0.0.40
codegen_flags: <defaults>
</compile_context>

<pallas_src>
import functools

import jax
import jax.numpy as jnp
from jax.experimental import pallas as pl
from jax.experimental.pallas import tpu as pltpu

_LANE = 128


def _round_up(x, m):
    return ((x + m - 1) // m) * m


def _pad_to(x, target_shape):
    pads = [(0, t - s) for s, t in zip(x.shape, target_shape)]
    if any(p[1] for p in pads):
        x = jnp.pad(x, pads)
    return x


def _pick_tile(dim, target):
    """Largest 128-multiple <= target that divides round_up(dim, 128)."""
    dim_pad = _round_up(dim, _LANE)
    limit = min(target, dim_pad)
    best = _LANE
    for cand in range(_LANE, limit + 1, _LANE):
        if dim_pad % cand == 0:
            best = cand
    return best, dim_pad


def _shrink_tile(dim_pad, cur):
    """Next smaller 128-multiple divisor of dim_pad (>= 128)."""
    for cand in range(cur - _LANE, _LANE - 1, -_LANE):
        if dim_pad % cand == 0:
            return cand
    return _LANE


def _gemm_kernel_tn(a_ref, b_ref, o_ref, acc_ref):
    """Streamed weight: acc += A[tm,tk] @ W[tk,tn] (weight already [K, N])."""
    k = pl.program_id(2)
    prod = jnp.dot(a_ref[...], b_ref[...], preferred_element_type=jnp.float32)

    @pl.when(k == 0)
    def _():
        acc_ref[...] = prod          # write directly, no zero + add

    @pl.when(k > 0)
    def _():
        acc_ref[...] += prod

    @pl.when(k == pl.num_programs(2) - 1)
    def _():
        o_ref[...] = acc_ref[...].astype(o_ref.dtype)


def _gemm_kernel_tn_resident(a_ref, b_ref, o_ref, acc_ref, *, tk, tn, j_axis):
    """VMEM-resident weight: b_ref is the whole [K_pad, N_pad] weight (DMA'd once)."""
    k = pl.program_id(2)
    j = pl.program_id(j_axis)
    b_tile = b_ref[pl.ds(pl.multiple_of(k * tk, tk), tk),
                   pl.ds(pl.multiple_of(j * tn, tn), tn)]
    prod = jnp.dot(a_ref[...], b_tile, preferred_element_type=jnp.float32)

    @pl.when(k == 0)
    def _():
        acc_ref[...] = prod

    @pl.when(k > 0)
    def _():
        acc_ref[...] += prod

    @pl.when(k == pl.num_programs(2) - 1)
    def _():
        o_ref[...] = acc_ref[...].astype(o_ref.dtype)


def ag_gemm_pallas(a, weight, transed_weight, out_dtype, *,
                   tm_target=1024, tn_target=1024, tk_target=1024,
                   tile_vmem_budget=30 * 1024 * 1024,
                   resident_vmem_budget=36 * 1024 * 1024,
                   weight_resident_max_bytes=8 * 1024 * 1024,
                   vmem_limit_bytes=48 * 1024 * 1024,
                   weight_resident=None):
    """C[M,N] = A[M,K] @ W, where W is [N,K] (transed_weight=False) or [K,N]."""
    M, K = a.shape
    if transed_weight:
        Kw, N = weight.shape
        w_kn = weight
    else:
        N, Kw = weight.shape
        # One wrapper-side transpose (single HBM pass over the weight) so the
        # kernel always contracts on the weight's sublane dim; avoids repeated
        # in-kernel XLU transposes of [tn, tk] tiles every k-step.
        w_kn = jnp.transpose(weight)
    assert Kw == K, f"K mismatch: {Kw} vs {K}"

    tm, M_pad = _pick_tile(M, tm_target)
    tn, N_pad = _pick_tile(N, tn_target)
    tk, K_pad = _pick_tile(K, tk_target)

    in_bytes = jnp.dtype(a.dtype).itemsize
    out_bytes = jnp.dtype(out_dtype).itemsize

    def _tile_vmem(tm_, tn_, tk_):
        # double-buffered A, B, out tiles + f32 accumulator
        return (2 * (tm_ * tk_ + tk_ * tn_) * in_bytes
                + 2 * tm_ * tn_ * out_bytes
                + tm_ * tn_ * 4)

    # Shrink tiles (divisor-preserving) until the double-buffered footprint
    # fits the budget (keeps v7x's 64 MiB physical VMEM safe).
    while _tile_vmem(tm, tn, tk) > tile_vmem_budget and max(tm, tn, tk) > _LANE:
        if tk >= tn and tk >= tm and tk > _LANE:
            tk = _shrink_tile(K_pad, tk)
        elif tn >= tm and tn > _LANE:
            tn = _shrink_tile(N_pad, tn)
        elif tm > _LANE:
            tm = _shrink_tile(M_pad, tm)
        else:
            break

    gi, gj, gk = M_pad // tm, N_pad // tn, K_pad // tk

    # Weight-resident decision: full weight DMA'd into VMEM once.
    weight_bytes = K_pad * N_pad * in_bytes
    resident_footprint = (2 * weight_bytes + 2 * tm * tk * in_bytes
                          + 2 * tm * tn * out_bytes + tm * tn * 4)
    if weight_resident is None:
        weight_resident = (weight_bytes <= weight_resident_max_bytes
                           and resident_footprint <= resident_vmem_budget)

    a_p = _pad_to(a, (M_pad, K_pad))
    w_p = _pad_to(w_kn, (K_pad, N_pad))

    # Megacore balance (v7x has 2 TCs): put the larger parallel extent first.
    swap_mn = gj > gi
    if swap_mn:
        grid = (gj, gi, gk)
        a_map = lambda j, i, k: (i, k)
        o_map = lambda j, i, k: (i, j)
        b_map_stream = lambda j, i, k: (k, j)
        b_map_res = lambda j, i, k: (0, 0)
        j_axis = 0
    else:
        grid = (gi, gj, gk)
        a_map = lambda i, j, k: (i, k)
        o_map = lambda i, j, k: (i, j)
        b_map_stream = lambda i, j, k: (k, j)
        b_map_res = lambda i, j, k: (0, 0)
        j_axis = 1

    if weight_resident:
        b_spec = pl.BlockSpec((K_pad, N_pad), b_map_res)
        kernel = functools.partial(_gemm_kernel_tn_resident,
                                   tk=tk, tn=tn, j_axis=j_axis)
        b_read_factor = 1
    else:
        b_spec = pl.BlockSpec((tk, tn), b_map_stream)
        kernel = _gemm_kernel_tn
        b_read_factor = gi

    cost = pl.CostEstimate(
        flops=2 * M_pad * N_pad * K_pad,
        transcendentals=0,
        bytes_accessed=(gj * M_pad * K_pad * in_bytes
                        + b_read_factor * K_pad * N_pad * in_bytes
                        + M_pad * N_pad * out_bytes),
    )

    out = pl.pallas_call(
        kernel,
        out_shape=jax.ShapeDtypeStruct((M_pad, N_pad), out_dtype),
        grid_spec=pltpu.PrefetchScalarGridSpec(
            num_scalar_prefetch=0,
            grid=grid,
            in_specs=[pl.BlockSpec((tm, tk), a_map), b_spec],
            out_specs=pl.BlockSpec((tm, tn), o_map),
            scratch_shapes=[pltpu.VMEM((tm, tn), jnp.float32)],
        ),
        compiler_params=pltpu.CompilerParams(
            dimension_semantics=("parallel", "parallel", "arbitrary"),
            vmem_limit_bytes=vmem_limit_bytes,
        ),
        cost_estimate=cost,
    )(a_p, w_p)

    if (M_pad, N_pad) != (M, N):
        out = out[:M, :N]
    return out


class AGGemmIntraNode:
    """JAX/Pallas re-implementation of the AllGather+GEMM module.

    On a single TPU device the intra-node all-gather over `tp_group` is
    emulated by stacking the per-rank input shards along M (pure data
    movement / glue); the GEMM itself is the Pallas kernel.
    """

    def __init__(self, world_size, max_M, N, K, M_PER_CHUNK,
                 input_dtype, output_dtype):
        assert max_M % world_size == 0
        assert max_M % M_PER_CHUNK == 0
        self.world_size = world_size
        self.max_M = max_M
        self.N = N
        self.K = K
        self.M_PER_CHUNK = M_PER_CHUNK
        self.input_dtype = input_dtype
        self.output_dtype = output_dtype
        # TODO(synk): on a real multi-chip TPU slice, overlap the all-gather with
        # the GEMM: issue per-M_PER_CHUNK pltpu.make_async_remote_copy pushes into
        # a gather buffer and gate each M-tile's compute on scalar-prefetched
        # chunk-ready flags / pl.semaphore_wait instead of the blocking reshape.
        # TODO(synk): cache per-weight cast/pre-transpose across forward calls
        # (weight arrives per-call here, matching the PyTorch signature).

    def forward(self, input_shards, weight, transed_weight):
        # input_shards: [world_size, M_local, K]  (one shard per rank)
        ws, m_local, K = input_shards.shape
        assert ws == self.world_size and K == self.K
        assert ws * m_local == self.max_M
        if transed_weight:
            assert weight.shape[0] == K  # [K, N]
        else:
            assert weight.shape[1] == K  # [N, K]
        # "All-gather": concatenate rank shards along M (single-device glue).
        a = input_shards.reshape(self.max_M, K).astype(self.input_dtype)
        return ag_gemm_pallas(
            a, weight.astype(self.input_dtype), transed_weight, self.output_dtype
        )

    __call__ = forward


if __name__ == "__main__":
    # Small, module-consistent shapes.
    world_size = 4
    max_M = 256          # divisible by world_size and M_PER_CHUNK
    N = 128
    K = 256
    M_PER_CHUNK = 64
    input_dtype = jnp.bfloat16
    output_dtype = jnp.bfloat16

    M_local = max_M // world_size

    key = jax.random.PRNGKey(0)
    k_in, k_w, k_a2, k_w2 = jax.random.split(key, 4)
    input_shards = jax.random.normal(
        k_in, (world_size, M_local, K), dtype=jnp.float32
    ).astype(input_dtype)
    weight_nk = jax.random.normal(
        k_w, (N, K), dtype=jnp.float32
    ).astype(input_dtype)
    weight_kn = jnp.transpose(weight_nk)  # [K, N] for the transed path

    mod = AGGemmIntraNode(world_size, max_M, N, K, M_PER_CHUNK,
                          input_dtype, output_dtype)

    # Pure-JAX reference (f32 accumulation from the same bf16 inputs).
    a_full = input_shards.reshape(max_M, K).astype(jnp.float32)
    ref = a_full @ weight_nk.astype(jnp.float32).T
    scale = float(jnp.max(jnp.abs(ref)))
    tol = 0.02 * scale + 1e-3

    # Path 1: weight as [N, K], transed_weight=False (weight-resident path).
    out_nt = jax.block_until_ready(mod(input_shards, weight_nk, False))
    assert out_nt.shape == (max_M, N) and out_nt.dtype == output_dtype
    err_nt = float(jnp.max(jnp.abs(out_nt.astype(jnp.float32) - ref)))
    assert err_nt <= tol, f"non-transposed path err {err_nt}"

    # Path 2: weight as [K, N], transed_weight=True (weight-resident path).
    out_tn = jax.block_until_ready(mod(input_shards, weight_kn, True))
    assert out_tn.shape == (max_M, N) and out_tn.dtype == output_dtype
    err_tn = float(jnp.max(jnp.abs(out_tn.astype(jnp.float32) - ref)))
    assert err_tn <= tol, f"transposed path err {err_tn}"

    # Path 3: force the streamed-weight kernel (covers the large-weight path).
    a_gathered = a_full.astype(input_dtype)
    out_stream = jax.block_until_ready(
        ag_gemm_pallas(a_gathered, weight_nk, False, output_dtype,
                       weight_resident=False))
    err_st = float(jnp.max(jnp.abs(out_stream.astype(jnp.float32) - ref)))
    assert err_st <= tol, f"streamed-weight path err {err_st}"

    # Path 4: non-128-aligned shapes exercise divisor tiling + pad/slice logic.
    M2, N2, K2 = 96, 176, 200
    a2 = jax.random.normal(k_a2, (M2, K2), dtype=jnp.float32)
    w2_nk = jax.random.normal(k_w2, (N2, K2), dtype=jnp.float32)
    ref2 = a2 @ w2_nk.T
    out2 = jax.block_until_ready(
        ag_gemm_pallas(a2, w2_nk, False, jnp.float32))
    scale2 = float(jnp.max(jnp.abs(ref2)))
    err2 = float(jnp.max(jnp.abs(out2 - ref2)))
    assert out2.shape == (M2, N2)
    assert err2 <= 0.02 * scale2 + 1e-3, f"odd-shape path err {err2}"

    print("KERNEL_OK")
</pallas_src>

<mosaic_0001>
module attributes {stable_mosaic.version = 11 : i64} {
  func.func @_gemm_kernel_tn_resident(%arg0: i32, %arg1: i32, %arg2: i32, %arg3: memref<256x256xbf16, #tpu.memory_space<vmem>>, %arg4: memref<256x128xbf16, #tpu.memory_space<vmem>>, %arg5: memref<256x128xbf16, #tpu.memory_space<vmem>>, %arg6: memref<256x128xf32, #tpu.memory_space<vmem>>) attributes {dimension_semantics = [#tpu.dimension_semantics<parallel>, #tpu.dimension_semantics<parallel>, #tpu.dimension_semantics<arbitrary>], iteration_bounds = array<i64: 1, 1, 1>, scalar_prefetch = 0 : i64, scratch_operands = 1 : i64, tpu.core_type = #tpu.core_type<tc>, window_params = [{transform_indices = @transform_0, window_bounds = array<i64: 256, 256>}, {pipeline_mode = #tpu.pipeline_mode<synchronous>, transform_indices = @transform_1, window_bounds = array<i64: 256, 128>}, {transform_indices = @transform_2, window_bounds = array<i64: 256, 128>}]} {
    %c256_i32 = arith.constant 256 : i32
    %0 = arith.muli %arg2, %c256_i32 : i32
    %1 = tpu.assume_multiple %0, 256 : i32
    %c128_i32 = arith.constant 128 : i32
    %2 = arith.muli %arg1, %c128_i32 : i32
    %3 = tpu.assume_multiple %2, 128 : i32
    %4 = arith.index_cast %1 : i32 to index
    %5 = arith.index_cast %3 : i32 to index
    %6 = vector.load %arg4[%4, %5] : memref<256x128xbf16, #tpu.memory_space<vmem>>, vector<256x128xbf16>
    %c0 = arith.constant 0 : index
    %c0_0 = arith.constant 0 : index
    %7 = vector.load %arg3[%c0, %c0_0] : memref<256x256xbf16, #tpu.memory_space<vmem>>, vector<256x256xbf16>
    %cst = arith.constant dense<0.000000e+00> : vector<256x128xf32>
    %8 = tpu.matmul %7, %6, %cst {dimension_numbers = #tpu.dot_dimension_numbers<[1], [0], [0], [1], [0, 0, 1, 1], [], []>} : vector<256x256xbf16>, vector<256x128xbf16>, vector<256x128xf32> -> vector<256x128xf32>
    %c0_i32 = arith.constant 0 : i32
    %9 = arith.cmpi eq, %arg2, %c0_i32 : i32
    %10 = arith.extui %9 : i1 to i32
    %c0_i32_1 = arith.constant 0 : i32
    %11 = arith.cmpi ne, %10, %c0_i32_1 : i32
    scf.if %11 {
      %c0_6 = arith.constant 0 : index
      %c0_7 = arith.constant 0 : index
      %18 = vector.load %arg6[%c0_6, %c0_7] : memref<256x128xf32, #tpu.memory_space<vmem>>, vector<256x128xf32>
      tpu.vector_store %arg6[%c0_6, %c0_7], %8 {strides = array<i32>} : memref<256x128xf32, #tpu.memory_space<vmem>>, vector<256x128xf32>,
    } else {
    }
    %c0_i32_2 = arith.constant 0 : i32
    %12 = arith.cmpi sgt, %arg2, %c0_i32_2 : i32
    %13 = arith.extui %12 : i1 to i32
    %c0_i32_3 = arith.constant 0 : i32
    %14 = arith.cmpi ne, %13, %c0_i32_3 : i32
    scf.if %14 {
      %c0_6 = arith.constant 0 : index
      %c0_7 = arith.constant 0 : index
      %18 = vector.load %arg6[%c0_6, %c0_7] : memref<256x128xf32, #tpu.memory_space<vmem>>, vector<256x128xf32>
      %19 = arith.addf %18, %8 : vector<256x128xf32>
      %c0_8 = arith.constant 0 : index
      %c0_9 = arith.constant 0 : index
      %20 = vector.load %arg6[%c0_8, %c0_9] : memref<256x128xf32, #tpu.memory_space<vmem>>, vector<256x128xf32>
      tpu.vector_store %arg6[%c0_8, %c0_9], %19 {strides = array<i32>} : memref<256x128xf32, #tpu.memory_space<vmem>>, vector<256x128xf32>,
    } else {
    }
    %c0_i32_4 = arith.constant 0 : i32
    %15 = arith.cmpi eq, %arg2, %c0_i32_4 : i32
    %16 = arith.extui %15 : i1 to i32
    %c0_i32_5 = arith.constant 0 : i32
    %17 = arith.cmpi ne, %16, %c0_i32_5 : i32
    scf.if %17 {
      %c0_6 = arith.constant 0 : index
      %c0_7 = arith.constant 0 : index
      %18 = vector.load %arg6[%c0_6, %c0_7] : memref<256x128xf32, #tpu.memory_space<vmem>>, vector<256x128xf32>
      %19 = arith.truncf %18 : vector<256x128xf32> to vector<256x128xbf16>
      %c0_8 = arith.constant 0 : index
      %c0_9 = arith.constant 0 : index
      %20 = vector.load %arg5[%c0_8, %c0_9] : memref<256x128xbf16, #tpu.memory_space<vmem>>, vector<256x128xbf16>
      tpu.vector_store %arg5[%c0_8, %c0_9], %19 {strides = array<i32>} : memref<256x128xbf16, #tpu.memory_space<vmem>>, vector<256x128xbf16>,
    } else {
    }
    return
  }
  func.func @transform_0(%arg0: i32, %arg1: i32, %arg2: i32) -> (i32, i32) {
    %c0_i32 = arith.constant 0 : i32
    return %arg0, %arg2 : i32, i32
  }
  func.func @transform_1(%arg0: i32, %arg1: i32, %arg2: i32) -> (i32, i32) {
    %c0_i32 = arith.constant 0 : i32
    %c0_i32_0 = arith.constant 0 : i32
    %c0_i32_1 = arith.constant 0 : i32
    return %c0_i32, %c0_i32_0 : i32, i32
  }
  func.func @transform_2(%arg0: i32, %arg1: i32, %arg2: i32) -> (i32, i32) {
    %c0_i32 = arith.constant 0 : i32
    return %arg0, %arg1 : i32, i32
  }
}

</mosaic_0001>

<bundles_post_ra>
// kernel: tpu_custom_call.1
= control target key start
LH: loop header
LB: loop body
LE: loop exit
PB: predicated region body
PF: predicated region fallthrough
CT: control target
= control target key end

     0   :  { %7 = vsyncpa [#allocation4], 0  ;;  %s1425_s0 = inlined_call_operand.hbm [shape: bf16[256,256], index: 0, kind: input, shape index: {}]   ;;  %s1426_s1 = inlined_call_operand.hbm [shape: bf16[256,128], index: 1, kind: input, shape index: {}]   ;;  %s1427_s2 = inlined_call_operand.hbm [shape: bf16[256,128], index: 2, kind: output, shape index: {}]  }
   0x1   :  { %8 = vsyncpa [#allocation7], 0 }
   0x2   :  { %9 = vsyncpa [#allocation5], 0  ;;  %s1361_s9 = smov [#allocation3]   ;;  %s1289_s13 = scalar_lea.hbm %s1425_s0, 4096 }
   0x3   :  { %s15_s10 = sshll.u32 %s1361_s9, 4  ;;  %p1290_p0 = scmp.ne.s32.totalorder %s1425_s0, %s1289_s13  ;;  %s16_s10 = int_to_ptr.vmem [resolvable:$true] %s15_s10 }
   0x4   :  { %p1293_p1 = scmp.lt.u32.totalorder %s1289_s13, %s1425_s0 }
   0x6   :  { %p1295_p2 = pnand %p1293_p1, %p1290_p0 }
   0x8   :  { %1298 = shalt.err (!%p1295_p2)
}
   0x9   :  { %s1299_s18 = scalar_lea.vmem %s16_s10, 4096  ;;  %p1304_p4 = scmp.lt.s32.totalorder %s16_s10, %s16_s10 }
   0xa   :  { %p1300_p3 = scmp.ne.s32.totalorder %s16_s10, %s1299_s18  ;;  %p1305_p5 = scmp.lt.s32.totalorder %s1299_s18, %s1299_s18 }
   0xc   :  { %p1306_p6 = por %p1305_p5, %p1304_p4 }
   0xe   :  { %p1307_p7 = pnand %p1306_p6, %p1300_p3 }
  0x10   :  { %1310 = shalt.err (!%p1307_p7)
}
  0x11   :  { %s1362_s19 = smov 128   ;;  %s1363_s20 = smov 8  }
  0x12   :  { %21 = dma.hbm_to_vmem [thread:$0]  %s1425_s0, 4096, %s16_s10, [#allocation4], %s1362_s19, %s1362_s19, %s1363_s20  }
  0x13   :  { %s1364_s23 = smov [#allocation6]   ;;  %s1311_s27 = scalar_lea.hbm %s1426_s1, 2048 }
  0x14   :  { %s27_s24 = sshll.u32 %s1364_s23, 4  ;;  %p1312_p8 = scmp.ne.s32.totalorder %s1426_s1, %s1311_s27  ;;  %s28_s24 = int_to_ptr.vmem [resolvable:$true] %s27_s24 }
  0x15   :  { %p1315_p9 = scmp.lt.u32.totalorder %s1311_s27, %s1426_s1 }
  0x17   :  { %p1317_p10 = pnand %p1315_p9, %p1312_p8 }
  0x19   :  { %1320 = shalt.err (!%p1317_p10)
}
  0x1a   :  { %s1321_s4 = scalar_lea.vmem %s28_s24, 2048  ;;  %p1326_p12 = scmp.lt.s32.totalorder %s28_s24, %s28_s24 }
  0x1b   :  { %p1322_p11 = scmp.ne.s32.totalorder %s28_s24, %s1321_s4  ;;  %p1327_p13 = scmp.lt.s32.totalorder %s1321_s4, %s1321_s4 }
  0x1d   :  { %p1328_p0 = por %p1327_p13, %p1326_p12 }
  0x1f   :  { %p1329_p1 = pnand %p1328_p0, %p1322_p11 }
  0x21   :  { %1332 = shalt.err (!%p1329_p1)
}
  0x22   :  { %s1365_s0 = smov 64   ;;  %s1366_s5 = smov 4  }
  0x23   :  { %33 = dma.hbm_to_vmem [thread:$0]  %s1426_s1, 2048, %s28_s24, [#allocation7], %s1365_s0, %s1365_s0, %s1366_s5  }
  0x24   :  { %1355 = dma.done.wait [#allocation4], 4096  }
  0x25   :  { %1356 = vsyncadd [#allocation4], 4294963200 }
  0x26   :  { %1357 = dma.done.wait [#allocation7], 2048  }
  0x27   :  { %1358 = vsyncadd [#allocation7], 4294965248  ;;  %v1225_v0 = vld [vmem:[#allocation6 + $0x40] sm:$0xff]   ;;  %v1227_v2 = vld [vmem:[#allocation6 + $0x48] sm:$0xff]   ;;  %s1367_s1 = smov [#allocation8]  }
  0x28   :  { %v1226_v1 = vld [vmem:[#allocation6] sm:$0xff]   ;;  %1090 = vmatprep.subr.bf16.mxu0 %v1225_v0  ;;  %1202 = vmatprep.subr.bf16.mxu1 %v1225_v0  ;;  %v1228_v3 = vld [vmem:[#allocation6 + $0x8] sm:$0xff]   ;;  %v1229_v4 = vld [vmem:[#allocation6 + $0x50] sm:$0xff]   ;;  %s867_s8 = sshll.u32 %s1367_s1, 4  ;;  %s868_s8 = int_to_ptr.vmem [resolvable:$true] %s867_s8 }
  0x29   :  { %1091 = vmatpush3.bf16.msra.mxu0 %v1226_v1  ;;  %1210 = vmatpush3.bf16.msra.mxu1 %v1226_v1  ;;  %v1230_v5 = vld [vmem:[#allocation6 + $0x10] sm:$0xff]   ;;  %v1231_v6 = vld [vmem:[#allocation6 + $0x58] sm:$0xff]   ;;  %v1233_v8 = vld [vmem:[#allocation6 + $0x60] sm:$0xff]   ;;  %s1333_s9 = scalar_lea.vmem %s868_s8, 2048  ;;  %p1338_p3 = scmp.lt.s32.totalorder %s868_s8, %s868_s8 }
  0x2a   :  { %1092 = vmatprep.subr.bf16.mxu0 %v1227_v2  ;;  %1203 = vmatprep.subr.bf16.mxu1 %v1227_v2  ;;  %v1232_v7 = vld [vmem:[#allocation6 + $0x18] sm:$0xff]   ;;  %v1234_v9 = vld [vmem:[#allocation6 + $0x20] sm:$0xff]   ;;  %v1235_v10 = vld [vmem:[#allocation6 + $0x68] sm:$0xff]   ;;  %p1334_p2 = scmp.ne.s32.totalorder %s868_s8, %s1333_s9  ;;  %p1339_p4 = scmp.lt.s32.totalorder %s1333_s9, %s1333_s9 }
  0x2b   :  { %v1243_v11 = vld [vmem:[#allocation3 + $0x4] ss:$8 sps:$4 sm:$0xff]   ;;  %v1237_v14 = vld [vmem:[#allocation6 + $0x70] sm:$0xff]   ;;  %v1239_v16 = vld [vmem:[#allocation6 + $0x78] sm:$0xff]  }
  0x2c   :  { %v1246_v12 = vld [vmem:[#allocation3 + $0x84] ss:$8 sps:$4 sm:$0xff]   ;;  %402 = vmatprep.mubr.bf16.mxu0 %v1243_v11  ;;  %v1238_v15 = vld [vmem:[#allocation6 + $0x30] sm:$0xff]   ;;  %v1240_v17 = vld [vmem:[#allocation6 + $0x38] sm:$0xff]   ;;  %p1340_p5 = por %p1339_p4, %p1338_p3 }
  0x2d   :  { %1093 = vmatpush3.bf16.msra.mxu0 %v1228_v3  ;;  %1211 = vmatpush3.bf16.msra.mxu1 %v1228_v3  ;;  %v1236_v13 = vld [vmem:[#allocation6 + $0x28] sm:$0xff]   ;;  %v1247_v20 = vld [vmem:[#allocation3 + $0x14] ss:$8 sps:$4 sm:$0xff]   ;;  %v1251_v22 = vld [vmem:[#allocation3 + $0x10] ss:$8 sps:$4 sm:$0xff]  }
  0x2e   :  { %1094 = vmatprep.subr.bf16.mxu0 %v1229_v4  ;;  %1204 = vmatprep.subr.bf16.mxu1 %v1229_v4  ;;  %v1241_v18 = vld [vmem:[#allocation3] ss:$8 sps:$4 sm:$0xff]   ;;  %v1249_v21 = vld [vmem:[#allocation3 + $0x94] ss:$8 sps:$4 sm:$0xff]   ;;  %v1252_v23 = vld [vmem:[#allocation3 + $0x90] ss:$8 sps:$4 sm:$0xff]   ;;  %p1341_p6 = pnand %p1340_p5, %p1334_p2 }
  0x2f   :  { %466 = vmatprep.mubr.bf16.mxu1 %v1246_v12  ;;  %v1244_v19 = vld [vmem:[#allocation3 + $0x80] ss:$8 sps:$4 sm:$0xff]   ;;  %v1253_v24 = vld [vmem:[#allocation3 + $0x24] ss:$8 sps:$4 sm:$0xff]   ;;  %v1259_v28 = vld [vmem:[#allocation3 + $0x34] ss:$8 sps:$4 sm:$0xff]  }
  0x30   :  { %v1255_v25 = vld [vmem:[#allocation3 + $0xa4] ss:$8 sps:$4 sm:$0xff]   ;;  %v1257_v26 = vld [vmem:[#allocation3 + $0x20] ss:$8 sps:$4 sm:$0xff]   ;;  %v1261_v29 = vld [vmem:[#allocation3 + $0xb4] ss:$8 sps:$4 sm:$0xff]  }
  0x31   :  { %1095 = vmatpush3.bf16.msra.mxu0 %v1230_v5  ;;  %1212 = vmatpush3.bf16.msra.mxu1 %v1230_v5  ;;  %v1258_v27 = vld [vmem:[#allocation3 + $0xa0] ss:$8 sps:$4 sm:$0xff]   ;;  %v1263_v30 = vld [vmem:[#allocation3 + $0x30] ss:$8 sps:$4 sm:$0xff]   ;;  %v1265_v32 = vld [vmem:[#allocation3 + $0x44] ss:$8 sps:$4 sm:$0xff]  }
  0x32   :  { %1096 = vmatprep.subr.bf16.mxu0 %v1231_v6  ;;  %1205 = vmatprep.subr.bf16.mxu1 %v1231_v6  ;;  %v1264_v31 = vld [vmem:[#allocation3 + $0xb0] ss:$8 sps:$4 sm:$0xff]   ;;  %v1267_v33 = vld [vmem:[#allocation3 + $0xc4] ss:$8 sps:$4 sm:$0xff]   ;;  %v1269_v34 = vld [vmem:[#allocation3 + $0x40] ss:$8 sps:$4 sm:$0xff]  }
  0x33   :  { %v1270_v35 = vld [vmem:[#allocation3 + $0xc0] ss:$8 sps:$4 sm:$0xff]   ;;  %v1271_v36 = vld [vmem:[#allocation3 + $0x54] ss:$8 sps:$4 sm:$0xff]   ;;  %v1275_v38 = vld [vmem:[#allocation3 + $0x50] ss:$8 sps:$4 sm:$0xff]  }
  0x34   :  { %v1273_v37 = vld [vmem:[#allocation3 + $0xd4] ss:$8 sps:$4 sm:$0xff]   ;;  %v1276_v39 = vld [vmem:[#allocation3 + $0xd0] ss:$8 sps:$4 sm:$0xff]   ;;  %v1277_v40 = vld [vmem:[#allocation3 + $0x64] ss:$8 sps:$4 sm:$0xff]  }
  0x35   :  { %1097 = vmatpush3.bf16.msra.mxu0 %v1232_v7  ;;  %1213 = vmatpush3.bf16.msra.mxu1 %v1232_v7  ;;  %v1279_v41 = vld [vmem:[#allocation3 + $0xe4] ss:$8 sps:$4 sm:$0xff]   ;;  %v1281_v42 = vld [vmem:[#allocation3 + $0x60] ss:$8 sps:$4 sm:$0xff]   ;;  %v1283_v44 = vld [vmem:[#allocation3 + $0x74] ss:$8 sps:$4 sm:$0xff]  }
  0x36   :  { %1098 = vmatprep.subr.bf16.mxu0 %v1233_v8  ;;  %1206 = vmatprep.subr.bf16.mxu1 %v1233_v8  ;;  %v1282_v43 = vld [vmem:[#allocation3 + $0xe0] ss:$8 sps:$4 sm:$0xff]   ;;  %v1285_v45 = vld [vmem:[#allocation3 + $0xf4] ss:$8 sps:$4 sm:$0xff]   ;;  %v1287_v46 = vld [vmem:[#allocation3 + $0x70] ss:$8 sps:$4 sm:$0xff]  }
  0x37   :  { %v1288_v47 = vld [vmem:[#allocation3 + $0xf0] ss:$8 sps:$4 sm:$0xff]  }
  0x39   :  { %1099 = vmatpush3.bf16.msra.mxu0 %v1234_v9  ;;  %1214 = vmatpush3.bf16.msra.mxu1 %v1234_v9 }
  0x3a   :  { %1100 = vmatprep.subr.bf16.mxu0 %v1235_v10  ;;  %1207 = vmatprep.subr.bf16.mxu1 %v1235_v10 }
  0x3d   :  { %1101 = vmatpush3.bf16.msra.mxu0 %v1236_v13  ;;  %1215 = vmatpush3.bf16.msra.mxu1 %v1236_v13 }
  0x3e   :  { %1102 = vmatprep.subr.bf16.mxu0 %v1237_v14  ;;  %1208 = vmatprep.subr.bf16.mxu1 %v1237_v14 }
  0x41   :  { %1103 = vmatpush3.bf16.msra.mxu0 %v1238_v15  ;;  %1216 = vmatpush3.bf16.msra.mxu1 %v1238_v15 }
  0x42   :  { %1104 = vmatprep.subr.bf16.mxu0 %v1239_v16  ;;  %1209 = vmatprep.subr.bf16.mxu1 %v1239_v16 }
  0x45   :  { %1105 = vmatpush3.bf16.msra.mxu0 %v1240_v17  ;;  %1217 = vmatpush3.bf16.msra.mxu1 %v1240_v17 }
  0x48   :  { %403 = vmatmul.mubr.bf16.vlgmr.msra.gmra.mrb[0].mxu0 %v1241_v18  ;;  %467 = vmatmul.mubr.bf16.vlgmr.msra.gmra.mrb[0].mxu1 %v1244_v19 }
  0x49   :  { %410 = vmatprep.mubr.bf16.mxu0 %v1247_v20  ;;  %474 = vmatprep.mubr.bf16.mxu1 %v1249_v21 }
  0x50   :  { %411 = vmatmul.mubr.bf16.gmra.mrb[4].mxu0 %v1251_v22  ;;  %475 = vmatmul.mubr.bf16.gmra.mrb[4].mxu1 %v1252_v23 }
  0x51   :  { %418 = vmatprep.mubr.bf16.mxu0 %v1253_v24  ;;  %482 = vmatprep.mubr.bf16.mxu1 %v1255_v25 }
  0x58   :  { %419 = vmatmul.mubr.bf16.gmra.mrb[8].mxu0 %v1257_v26  ;;  %483 = vmatmul.mubr.bf16.gmra.mrb[8].mxu1 %v1258_v27 }
  0x59   :  { %426 = vmatprep.mubr.bf16.mxu0 %v1259_v28  ;;  %490 = vmatprep.mubr.bf16.mxu1 %v1261_v29 }
  0x60   :  { %427 = vmatmul.mubr.bf16.gmra.mrb[12].mxu0 %v1263_v30  ;;  %491 = vmatmul.mubr.bf16.gmra.mrb[12].mxu1 %v1264_v31 }
  0x61   :  { %434 = vmatprep.mubr.bf16.mxu0 %v1265_v32  ;;  %498 = vmatprep.mubr.bf16.mxu1 %v1267_v33 }
  0x68   :  { %435 = vmatmul.mubr.bf16.gmra.mrb[16].mxu0 %v1269_v34  ;;  %499 = vmatmul.mubr.bf16.gmra.mrb[16].mxu1 %v1270_v35 }
  0x69   :  { %442 = vmatprep.mubr.bf16.mxu0 %v1271_v36  ;;  %506 = vmatprep.mubr.bf16.mxu1 %v1273_v37 }
  0x70   :  { %443 = vmatmul.mubr.bf16.gmra.mrb[20].mxu0 %v1275_v38  ;;  %507 = vmatmul.mubr.bf16.gmra.mrb[20].mxu1 %v1276_v39 }
  0x71   :  { %450 = vmatprep.mubr.bf16.mxu0 %v1277_v40  ;;  %514 = vmatprep.mubr.bf16.mxu1 %v1279_v41 }
  0x78   :  { %451 = vmatmul.mubr.bf16.gmra.mrb[24].mxu0 %v1281_v42  ;;  %515 = vmatmul.mubr.bf16.gmra.mrb[24].mxu1 %v1282_v43 }
  0x79   :  { %458 = vmatprep.mubr.bf16.mxu0 %v1283_v44  ;;  %522 = vmatprep.mubr.bf16.mxu1 %v1285_v45 }
  0x80   :  { %459 = vmatmul.mubr.bf16.gmra.mrb[28].mxu0 %v1287_v46  ;;  %523 = vmatmul.mubr.bf16.gmra.mrb[28].mxu1 %v1288_v47 }
 0x11b   :  { %v1106_v48 = vpop.f32.mrb[0].mxu0  ;;  %v1154_v49 = vpop.f32.mrb[0].mxu1 }
 0x11c   :  { %v1107_v50 = vpop.f32.mrb[1].mxu0  ;;  %v1155_v51 = vpop.f32.mrb[1].mxu1 }
 0x11d   :  { %v1108_v52 = vadd.f32 %v1107_v50, %v1106_v48  ;;  %v1156_v53 = vadd.f32 %v1155_v51, %v1154_v49  ;;  %v1109_v54 = vpop.f32.mrb[2].mxu0  ;;  %v1157_v55 = vpop.f32.mrb[2].mxu1 }
 0x11e   :  { %v1110_v56 = vpop.f32.mrb[3].mxu0  ;;  %v1158_v57 = vpop.f32.mrb[3].mxu1 }
 0x11f   :  { %v1111_v58 = vadd.f32 %v1110_v56, %v1109_v54  ;;  %v1159_v59 = vadd.f32 %v1158_v57, %v1157_v55 }
 0x121   :  { %v998_v60 = vpack.c.bf16 %v1111_v58, %v1108_v52  ;;  %v1038_v61 = vpack.c.bf16 %v1159_v59, %v1156_v53 }
 0x123   :  { %999 = vst [vmem:[#allocation8] sm:$0xff] %v998_v60   ;;  %1082 = vst [vmem:[#allocation8 + $0x40] sm:$0xff] %v1038_v61   ;;  %v1112_v62 = vpop.f32.mrb[4].mxu0  ;;  %v1160_v63 = vpop.f32.mrb[4].mxu1 }
 0x124   :  { %v1113_v0 = vpop.f32.mrb[5].mxu0  ;;  %v1161_v1 = vpop.f32.mrb[5].mxu1 }
 0x125   :  { %v1114_v2 = vadd.f32 %v1113_v0, %v1112_v62  ;;  %v1162_v3 = vadd.f32 %v1161_v1, %v1160_v63  ;;  %v1115_v4 = vpop.f32.mrb[6].mxu0  ;;  %v1163_v5 = vpop.f32.mrb[6].mxu1 }
 0x126   :  { %v1116_v6 = vpop.f32.mrb[7].mxu0  ;;  %v1164_v7 = vpop.f32.mrb[7].mxu1 }
 0x127   :  { %v1117_v8 = vadd.f32 %v1116_v6, %v1115_v4  ;;  %v1165_v9 = vadd.f32 %v1164_v7, %v1163_v5 }
 0x129   :  { %v1003_v10 = vpack.c.bf16 %v1117_v8, %v1114_v2  ;;  %v1043_v11 = vpack.c.bf16 %v1165_v9, %v1162_v3 }
 0x12b   :  { %1075 = vst [vmem:[#allocation8 + $0x8] sm:$0xff] %v1003_v10   ;;  %1083 = vst [vmem:[#allocation8 + $0x48] sm:$0xff] %v1043_v11   ;;  %v1118_v12 = vpop.f32.mrb[8].mxu0  ;;  %v1166_v13 = vpop.f32.mrb[8].mxu1 }
 0x12c   :  { %v1119_v14 = vpop.f32.mrb[9].mxu0  ;;  %v1167_v15 = vpop.f32.mrb[9].mxu1 }
 0x12d   :  { %v1120_v16 = vadd.f32 %v1119_v14, %v1118_v12  ;;  %v1168_v17 = vadd.f32 %v1167_v15, %v1166_v13  ;;  %v1121_v18 = vpop.f32.mrb[10].mxu0  ;;  %v1169_v19 = vpop.f32.mrb[10].mxu1 }
 0x12e   :  { %v1122_v20 = vpop.f32.mrb[11].mxu0  ;;  %v1170_v21 = vpop.f32.mrb[11].mxu1 }
 0x12f   :  { %v1123_v22 = vadd.f32 %v1122_v20, %v1121_v18  ;;  %v1171_v23 = vadd.f32 %v1170_v21, %v1169_v19 }
 0x131   :  { %v1008_v24 = vpack.c.bf16 %v1123_v22, %v1120_v16  ;;  %v1048_v25 = vpack.c.bf16 %v1171_v23, %v1168_v17 }
 0x133   :  { %1076 = vst [vmem:[#allocation8 + $0x10] sm:$0xff] %v1008_v24   ;;  %1084 = vst [vmem:[#allocation8 + $0x50] sm:$0xff] %v1048_v25   ;;  %v1124_v26 = vpop.f32.mrb[12].mxu0  ;;  %v1172_v27 = vpop.f32.mrb[12].mxu1 }
 0x134   :  { %v1125_v28 = vpop.f32.mrb[13].mxu0  ;;  %v1173_v29 = vpop.f32.mrb[13].mxu1 }
 0x135   :  { %v1126_v30 = vadd.f32 %v1125_v28, %v1124_v26  ;;  %v1174_v31 = vadd.f32 %v1173_v29, %v1172_v27  ;;  %v1127_v32 = vpop.f32.mrb[14].mxu0  ;;  %v1175_v33 = vpop.f32.mrb[14].mxu1 }
 0x136   :  { %v1128_v34 = vpop.f32.mrb[15].mxu0  ;;  %v1176_v35 = vpop.f32.mrb[15].mxu1 }
 0x137   :  { %v1129_v36 = vadd.f32 %v1128_v34, %v1127_v32  ;;  %v1177_v37 = vadd.f32 %v1176_v35, %v1175_v33 }
 0x139   :  { %v1013_v38 = vpack.c.bf16 %v1129_v36, %v1126_v30  ;;  %v1053_v39 = vpack.c.bf16 %v1177_v37, %v1174_v31 }
 0x13b   :  { %1077 = vst [vmem:[#allocation8 + $0x18] sm:$0xff] %v1013_v38   ;;  %1085 = vst [vmem:[#allocation8 + $0x58] sm:$0xff] %v1053_v39   ;;  %v1130_v40 = vpop.f32.mrb[16].mxu0  ;;  %v1178_v41 = vpop.f32.mrb[16].mxu1 }
 0x13c   :  { %v1131_v42 = vpop.f32.mrb[17].mxu0  ;;  %v1179_v43 = vpop.f32.mrb[17].mxu1 }
 0x13d   :  { %v1132_v44 = vadd.f32 %v1131_v42, %v1130_v40  ;;  %v1180_v45 = vadd.f32 %v1179_v43, %v1178_v41  ;;  %v1133_v46 = vpop.f32.mrb[18].mxu0  ;;  %v1181_v47 = vpop.f32.mrb[18].mxu1 }
 0x13e   :  { %v1134_v48 = vpop.f32.mrb[19].mxu0  ;;  %v1182_v49 = vpop.f32.mrb[19].mxu1 }
 0x13f   :  { %v1135_v50 = vadd.f32 %v1134_v48, %v1133_v46  ;;  %v1183_v51 = vadd.f32 %v1182_v49, %v1181_v47 }
 0x141   :  { %v1018_v52 = vpack.c.bf16 %v1135_v50, %v1132_v44  ;;  %v1058_v53 = vpack.c.bf16 %v1183_v51, %v1180_v45 }
 0x143   :  { %1078 = vst [vmem:[#allocation8 + $0x20] sm:$0xff] %v1018_v52   ;;  %1086 = vst [vmem:[#allocation8 + $0x60] sm:$0xff] %v1058_v53   ;;  %v1136_v54 = vpop.f32.mrb[20].mxu0  ;;  %v1184_v55 = vpop.f32.mrb[20].mxu1 }
 0x144   :  { %v1137_v56 = vpop.f32.mrb[21].mxu0  ;;  %v1185_v57 = vpop.f32.mrb[21].mxu1 }
 0x145   :  { %v1138_v58 = vadd.f32 %v1137_v56, %v1136_v54  ;;  %v1186_v59 = vadd.f32 %v1185_v57, %v1184_v55  ;;  %v1139_v60 = vpop.f32.mrb[22].mxu0  ;;  %v1187_v61 = vpop.f32.mrb[22].mxu1 }
 0x146   :  { %v1140_v62 = vpop.f32.mrb[23].mxu0  ;;  %v1188_v63 = vpop.f32.mrb[23].mxu1 }
 0x147   :  { %v1141_v0 = vadd.f32 %v1140_v62, %v1139_v60  ;;  %v1189_v1 = vadd.f32 %v1188_v63, %v1187_v61 }
 0x149   :  { %v1023_v2 = vpack.c.bf16 %v1141_v0, %v1138_v58  ;;  %v1063_v3 = vpack.c.bf16 %v1189_v1, %v1186_v59 }
 0x14b   :  { %1079 = vst [vmem:[#allocation8 + $0x28] sm:$0xff] %v1023_v2   ;;  %1087 = vst [vmem:[#allocation8 + $0x68] sm:$0xff] %v1063_v3   ;;  %v1142_v4 = vpop.f32.mrb[24].mxu0  ;;  %v1190_v5 = vpop.f32.mrb[24].mxu1 }
 0x14c   :  { %v1143_v6 = vpop.f32.mrb[25].mxu0  ;;  %v1191_v7 = vpop.f32.mrb[25].mxu1 }
 0x14d   :  { %v1144_v8 = vadd.f32 %v1143_v6, %v1142_v4  ;;  %v1192_v9 = vadd.f32 %v1191_v7, %v1190_v5  ;;  %v1145_v10 = vpop.f32.mrb[26].mxu0  ;;  %v1193_v11 = vpop.f32.mrb[26].mxu1 }
 0x14e   :  { %v1146_v12 = vpop.f32.mrb[27].mxu0  ;;  %v1194_v13 = vpop.f32.mrb[27].mxu1 }
 0x14f   :  { %v1147_v14 = vadd.f32 %v1146_v12, %v1145_v10  ;;  %v1195_v15 = vadd.f32 %v1194_v13, %v1193_v11 }
 0x151   :  { %v1028_v16 = vpack.c.bf16 %v1147_v14, %v1144_v8  ;;  %v1068_v17 = vpack.c.bf16 %v1195_v15, %v1192_v9 }
 0x153   :  { %1080 = vst [vmem:[#allocation8 + $0x30] sm:$0xff] %v1028_v16   ;;  %1088 = vst [vmem:[#allocation8 + $0x70] sm:$0xff] %v1068_v17   ;;  %v1148_v18 = vpop.f32.mrb[28].mxu0  ;;  %v1196_v19 = vpop.f32.mrb[28].mxu1 }
 0x154   :  { %v1149_v20 = vpop.f32.mrb[29].mxu0  ;;  %v1197_v21 = vpop.f32.mrb[29].mxu1 }
 0x155   :  { %v1150_v22 = vadd.f32 %v1149_v20, %v1148_v18  ;;  %v1198_v23 = vadd.f32 %v1197_v21, %v1196_v19  ;;  %v1151_v24 = vpop.f32.mrb[30].mxu0  ;;  %v1199_v25 = vpop.f32.mrb[30].mxu1 }
 0x156   :  { %v1152_v26 = vpop.f32.mrb[31].mxu0  ;;  %v1200_v27 = vpop.f32.mrb[31].mxu1 }
 0x157   :  { %v1153_v28 = vadd.f32 %v1152_v26, %v1151_v24  ;;  %v1201_v29 = vadd.f32 %v1200_v27, %v1199_v25 }
 0x159   :  { %v1033_v30 = vpack.c.bf16 %v1153_v28, %v1150_v22  ;;  %v1073_v31 = vpack.c.bf16 %v1201_v29, %v1198_v23 }
 0x15b   :  { %1081 = vst [vmem:[#allocation8 + $0x38] sm:$0xff] %v1033_v30   ;;  %1089 = vst [vmem:[#allocation8 + $0x78] sm:$0xff] %v1073_v31  }
 0x15c   :  { %1344 = shalt.err (!%p1341_p6)
}
 0x15d   :  { %s1345_s12 = scalar_lea.hbm %s1427_s2, 2048 }
 0x15e   :  { %p1346_p7 = scmp.ne.s32.totalorder %s1427_s2, %s1345_s12  ;;  %p1349_p8 = scmp.lt.u32.totalorder %s1345_s12, %s1427_s2 }
 0x160   :  { %p1351_p9 = pnand %p1349_p8, %p1346_p7 }
 0x162   :  { %1354 = shalt.err (!%p1351_p9)
}
 0x163   :  { %873 = dma.vmem_to_hbm [thread:$0]  %s868_s8, 2048, %s1427_s2, [#allocation5], %s1365_s0, %s1365_s0, %s1366_s5  }
 0x164   :  { %1359 = dma.done.wait [#allocation5], 2048  }
 0x165   :  { %1360 = vsyncadd [#allocation5], 4294965248 }
 0x166   :  { %877 = vsyncpa [#allocation4], 1 }
 0x167   :  { %878 = vsyncpa [#allocation7], 1 }
 0x168   :  { %879 = vsyncpa [#allocation5], 1 }

</bundles_post_ra>
